<compile_context>
chip_gen: v6e
topology: v6e:2x2x1
jax: 0.10.0
libtpu: 0.0.40
codegen_flags: <defaults>
</compile_context>

<pallas_src>
import jax
import jax.numpy as jnp
from jax.experimental import pallas as pl
from jax.experimental.pallas import tpu as pltpu

LANE = 128
MAX_BLOCK_ROWS = 2048   # 2048*128 edges/step: ~3.4 MiB/step, ~6.8 MiB double-buffered
ROW_ALIGN = 32          # int8 mask output needs sublane blocks in multiples of 32


def _round_up(x, m):
    return ((x + m - 1) // m) * m


def _dropedge_kernel(params_ref, u_ref, vals_ref, newvals_ref, mask_ref):
    # params_ref (SMEM): [0] = 1 - keepRate (drop threshold), [1] = 1 / keepRate
    # torch: keep = floor(rand + keepRate) == 1  <=>  rand >= 1 - keepRate
    keep = u_ref[...] >= params_ref[0]
    newvals_ref[...] = jnp.where(keep, vals_ref[...] * params_ref[1], jnp.float32(0.0))
    mask_ref[...] = keep.astype(jnp.int8)


def sp_adj_drop_edge(vals, idxs, keep_rate, rng):
    """DropEdge: keep each edge with prob keep_rate; kept vals scaled by 1/keep_rate.

    Returns (idxs, new_vals, keep_mask): same static nnz, dropped edges have
    value 0 and keep_mask False.
    """
    keep_rate = float(keep_rate)
    if not (0.0 < keep_rate <= 1.0):
        raise ValueError("keep_rate must be in (0, 1].")
    if isinstance(rng, int):
        rng = jax.random.PRNGKey(rng)

    nnz = vals.shape[0]
    rows_needed = (nnz + LANE - 1) // LANE
    block_rows = min(MAX_BLOCK_ROWS, _round_up(rows_needed, ROW_ALIGN))
    rows = _round_up(rows_needed, block_rows)
    padded = rows * LANE
    grid = (rows // block_rows,)

    vals2d = jnp.pad(vals.astype(jnp.float32), (0, padded - nnz)).reshape(rows, LANE)
    u2d = jax.random.uniform(rng, (rows, LANE), dtype=jnp.float32)
    params = jnp.array([1.0 - keep_rate, 1.0 / keep_rate], dtype=jnp.float32)

    new_vals2d, mask2d = pl.pallas_call(
        _dropedge_kernel,
        out_shape=(
            jax.ShapeDtypeStruct((rows, LANE), jnp.float32),
            jax.ShapeDtypeStruct((rows, LANE), jnp.int8),
        ),
        grid_spec=pltpu.PrefetchScalarGridSpec(
            num_scalar_prefetch=1,
            grid=grid,
            in_specs=[
                pl.BlockSpec((block_rows, LANE), lambda i, params: (i, 0)),
                pl.BlockSpec((block_rows, LANE), lambda i, params: (i, 0)),
            ],
            out_specs=[
                pl.BlockSpec((block_rows, LANE), lambda i, params: (i, 0)),
                pl.BlockSpec((block_rows, LANE), lambda i, params: (i, 0)),
            ],
        ),
        compiler_params=pltpu.CompilerParams(
            dimension_semantics=("parallel",),
        ),
    )(params, u2d, vals2d)

    new_vals = new_vals2d.reshape(-1)[:nnz]
    keep_mask = mask2d.reshape(-1)[:nnz].astype(jnp.bool_)

    # TODO(synk): torch compacts (newVals = vals[mask], newIdxs = idxs[:, mask]);
    # dynamic-shape compaction has no static-shape Pallas equivalent, so we
    # return full-size vals (dropped entries zeroed) plus the keep mask.
    return idxs, new_vals, keep_mask


if __name__ == "__main__":
    key = jax.random.PRNGKey(0)
    k1, k2, k3, k4 = jax.random.split(key, 4)

    num_nodes = 64
    nnz = 2048
    keep_rate = 0.7

    row_idx = jax.random.randint(k1, (nnz,), 0, num_nodes, dtype=jnp.int32)
    col_idx = jax.random.randint(k2, (nnz,), 0, num_nodes, dtype=jnp.int32)
    idxs = jnp.stack([row_idx, col_idx], axis=0)               # (2, nnz)
    vals = jax.random.uniform(k3, (nnz,), dtype=jnp.float32)   # (nnz,)

    new_idxs, new_vals, keep_mask = sp_adj_drop_edge(vals, idxs, keep_rate, k4)
    jax.block_until_ready((new_idxs, new_vals, keep_mask))

    # sanity: kept values == vals / keepRate, dropped values == 0
    expected = jnp.where(keep_mask, vals / keep_rate, 0.0)
    assert jnp.allclose(new_vals, expected, rtol=1e-6, atol=1e-6)
    assert new_idxs.shape == (2, nnz)
    # statistical sanity: keep fraction close to keep_rate
    frac = float(jnp.mean(keep_mask.astype(jnp.float32)))
    assert abs(frac - keep_rate) < 0.1

    print("KERNEL_OK")
</pallas_src>

<mosaic_0001>
module attributes {stable_mosaic.version = 11 : i64} {
  func.func @_dropedge_kernel(%arg0: i32, %arg1: memref<2xf32, #tpu.memory_space<smem>>, %arg2: memref<32x128xf32, #tpu.memory_space<vmem>>, %arg3: memref<32x128xf32, #tpu.memory_space<vmem>>, %arg4: memref<32x128xf32, #tpu.memory_space<vmem>>, %arg5: memref<32x128xi8, #tpu.memory_space<vmem>>) attributes {dimension_semantics = [#tpu.dimension_semantics<parallel>], iteration_bounds = array<i64: 1>, scalar_prefetch = 1 : i64, scratch_operands = 0 : i64, tpu.core_type = #tpu.core_type<tc>, window_params = [{transform_indices = @transform_0, window_bounds = array<i64: 32, 128>}, {transform_indices = @transform_1, window_bounds = array<i64: 32, 128>}, {transform_indices = @transform_2, window_bounds = array<i64: 32, 128>}, {transform_indices = @transform_3, window_bounds = array<i64: 32, 128>}]} {
    %c0 = arith.constant 0 : index
    %c0_0 = arith.constant 0 : index
    %0 = vector.load %arg2[%c0, %c0_0] : memref<32x128xf32, #tpu.memory_space<vmem>>, vector<32x128xf32>
    %c0_1 = arith.constant 0 : index
    %1 = memref.load %arg1[%c0_1] : memref<2xf32, #tpu.memory_space<smem>>
    %2 = vector.broadcast %1 : f32 to vector<32x128xf32>
    %3 = arith.cmpf oge, %0, %2 : vector<32x128xf32>
    %c0_2 = arith.constant 0 : index
    %c0_3 = arith.constant 0 : index
    %4 = vector.load %arg3[%c0_2, %c0_3] : memref<32x128xf32, #tpu.memory_space<vmem>>, vector<32x128xf32>
    %c1 = arith.constant 1 : index
    %5 = memref.load %arg1[%c1] : memref<2xf32, #tpu.memory_space<smem>>
    %6 = vector.broadcast %5 : f32 to vector<32x128xf32>
    %7 = arith.mulf %4, %6 : vector<32x128xf32>
    %cst = arith.constant 0.000000e+00 : f32
    %8 = vector.broadcast %cst : f32 to vector<32x128xf32>
    %9 = arith.select %3, %7, %8 : vector<32x128xi1>, vector<32x128xf32>
    %c0_4 = arith.constant 0 : index
    %c0_5 = arith.constant 0 : index
    %10 = vector.load %arg4[%c0_4, %c0_5] : memref<32x128xf32, #tpu.memory_space<vmem>>, vector<32x128xf32>
    tpu.vector_store %arg4[%c0_4, %c0_5], %9 {strides = array<i32>} : memref<32x128xf32, #tpu.memory_space<vmem>>, vector<32x128xf32>,
    %11 = arith.extui %3 : vector<32x128xi1> to vector<32x128xi8>
    %c0_6 = arith.constant 0 : index
    %c0_7 = arith.constant 0 : index
    %12 = vector.load %arg5[%c0_6, %c0_7] : memref<32x128xi8, #tpu.memory_space<vmem>>, vector<32x128xi8>
    tpu.vector_store %arg5[%c0_6, %c0_7], %11 {strides = array<i32>} : memref<32x128xi8, #tpu.memory_space<vmem>>, vector<32x128xi8>,
    return
  }
  func.func @transform_0(%arg0: i32, %arg1: memref<2xf32, #tpu.memory_space<smem>>) -> (i32, i32) {
    %c0_i32 = arith.constant 0 : i32
    %c0_i32_0 = arith.constant 0 : i32
    return %arg0, %c0_i32 : i32, i32
  }
  func.func @transform_1(%arg0: i32, %arg1: memref<2xf32, #tpu.memory_space<smem>>) -> (i32, i32) {
    %c0_i32 = arith.constant 0 : i32
    %c0_i32_0 = arith.constant 0 : i32
    return %arg0, %c0_i32 : i32, i32
  }
  func.func @transform_2(%arg0: i32, %arg1: memref<2xf32, #tpu.memory_space<smem>>) -> (i32, i32) {
    %c0_i32 = arith.constant 0 : i32
    %c0_i32_0 = arith.constant 0 : i32
    return %arg0, %c0_i32 : i32, i32
  }
  func.func @transform_3(%arg0: i32, %arg1: memref<2xf32, #tpu.memory_space<smem>>) -> (i32, i32) {
    %c0_i32 = arith.constant 0 : i32
    %c0_i32_0 = arith.constant 0 : i32
    return %arg0, %c0_i32 : i32, i32
  }
}

</mosaic_0001>

<bundles_post_ra>
// kernel: tpu_custom_call.1
= control target key start
LH: loop header
LB: loop body
LE: loop exit
PB: predicated region body
PF: predicated region fallthrough
CT: control target
= control target key end

     0   :  { %s222_s15 = smov [#allocation3]   ;;  %s289_s0 = inlined_call_operand.hbm [shape: f32[2], index: 0, kind: input, shape index: {}]   ;;  %s290_s1 = inlined_call_operand.hbm [shape: f32[32,128], index: 1, kind: input, shape index: {}]   ;;  %s291_s2 = inlined_call_operand.hbm [shape: f32[32,128], index: 2, kind: input, shape index: {}]   ;;  %s292_s3 = inlined_call_operand.hbm [shape: f32[32,128], index: 3, kind: output, shape index: {0}]   ;;  %s293_s4 = inlined_call_operand.hbm [shape: s8[32,128], index: 4, kind: output, shape index: {1}]  }
   0x1   :  { %11 = dma.hbm_to_smem %s289_s0, 16, %s222_s15, [#allocation2] }
   0x2   :  { %212 = dma.done.wait [#allocation2], 16 }
   0x3   :  { %213 = vsyncadd [#allocation2], 4294967280 }
   0x4   :  { %13 = sfence }
   0x5   :  { %14 = vsyncpa [#allocation5], 0 }
   0x6   :  { %15 = vsyncpa [#allocation8], 0 }
   0x7   :  { %16 = vsyncpa [#allocation6], 0 }
   0x8   :  { %17 = vsyncpa [#allocation11], 0  ;;  %s223_s18 = smov [#allocation4]  }
   0x9   :  { %s23_s19 = sshll.u32 %s223_s18, 4  ;;  %s24_s19 = int_to_ptr.vmem [resolvable:$true] %s23_s19 }
   0xa   :  { %s140_s20 = scalar_lea.vmem %s24_s19, 512  ;;  %p145_p1 = scmp.lt.s32.totalorder %s24_s19, %s24_s19 }
   0xb   :  { %p141_p0 = scmp.ne.s32.totalorder %s24_s19, %s140_s20  ;;  %p146_p2 = scmp.lt.s32.totalorder %s140_s20, %s140_s20 }
   0xd   :  { %p147_p3 = por %p146_p2, %p145_p1 }
   0xf   :  { %p148_p4 = pnand %p147_p3, %p141_p0 }
  0x11   :  { %151 = shalt.err (!%p148_p4)
}
  0x12   :  { %s224_s21 = smov 128   ;;  %s225_s22 = smov 8  }
  0x13   :  { %29 = dma.hbm_to_vmem [thread:$0]  %s290_s1, 512, %s24_s19, [#allocation5], %s224_s21, %s224_s21, %s225_s22  }
  0x14   :  { %s226_s24 = smov [#allocation7]  }
  0x15   :  { %s35_s25 = sshll.u32 %s226_s24, 4  ;;  %s36_s25 = int_to_ptr.vmem [resolvable:$true] %s35_s25 }
  0x16   :  { %s160_s26 = scalar_lea.vmem %s36_s25, 512  ;;  %p165_p6 = scmp.lt.s32.totalorder %s36_s25, %s36_s25 }
  0x17   :  { %p161_p5 = scmp.ne.s32.totalorder %s36_s25, %s160_s26  ;;  %p166_p7 = scmp.lt.s32.totalorder %s160_s26, %s160_s26 }
  0x19   :  { %p167_p8 = por %p166_p7, %p165_p6 }
  0x1b   :  { %p168_p9 = pnand %p167_p8, %p161_p5 }
  0x1d   :  { %171 = shalt.err (!%p168_p9)
}
  0x1e   :  { %41 = dma.hbm_to_vmem [thread:$0]  %s291_s2, 512, %s36_s25, [#allocation8], %s224_s21, %s224_s21, %s225_s22  }
  0x1f   :  { %214 = dma.done.wait [#allocation5], 512  }
  0x20   :  { %215 = vsyncadd [#allocation5], 4294966784 }
  0x21   :  { %216 = dma.done.wait [#allocation8], 512  }
  0x22   :  { %217 = vsyncadd [#allocation8], 4294966784  ;;  %s54_s1 = sld [smem:[#allocation3]]  ;;  %v50_v0 = vld [vmem:[#allocation4] sm:$0xff]  ;;  %v51_v3 = vld [vmem:[#allocation4 + $0x8] sm:$0xff]  ;;  %s227_s30 = smov [#allocation9]  }
  0x23   :  { %s115_s29 = sld [smem:[#allocation3 + $0x1]]  ;;  %v60_v2 = vld [vmem:[#allocation7] sm:$0xff]  ;;  %v61_v5 = vld [vmem:[#allocation7 + $0x8] sm:$0xff]  ;;  %v52_v6 = vld [vmem:[#allocation4 + $0x10] sm:$0xff]  ;;  %s88_s5 = sshll.u32 %s227_s30, 4  ;;  %v229_v19 = vmov 0   ;;  %s89_s5 = int_to_ptr.vmem [resolvable:$true] %s88_s5 }
  0x24   :  { %v62_v7 = vld [vmem:[#allocation7 + $0x10] sm:$0xff]  ;;  %v53_v11 = vld [vmem:[#allocation4 + $0x18] sm:$0xff]  ;;  %s228_s2 = smov [#allocation10]   ;;  %s172_s7 = scalar_lea.vmem %s89_s5, 512 }
  0x25   :  { %v63_v12 = vld [vmem:[#allocation7 + $0x18] sm:$0xff]  ;;  %s101_s6 = sshll.u32 %s228_s2, 4  ;;  %p173_p10 = scmp.ne.s32.totalorder %s89_s5, %s172_s7  ;;  %s102_s6 = int_to_ptr.vmem [resolvable:$true] %s101_s6 }
  0x26   :  { %p177_p11 = scmp.lt.s32.totalorder %s89_s5, %s89_s5  ;;  %p178_p12 = scmp.lt.s32.totalorder %s172_s7, %s172_s7 }
  0x28   :  { %v55_v1 = vstv %s54_s1  ;;  %p179_p13 = por %p178_p12, %p177_p11 }
  0x29   :  { %vm56_vm0 = vcmp.ge.f32.partialorder %v50_v0, %v55_v1  ;;  %v65_v4 = vstv %s115_s29  ;;  %vm57_vm1 = vcmp.ge.f32.partialorder %v51_v3, %v55_v1  ;;  %vm58_vm2 = vcmp.ge.f32.partialorder %v52_v6, %v55_v1 }
  0x2a   :  { %v66_v8 = vmul.f32 %v65_v4, %v60_v2  ;;  %v67_v9 = vmul.f32 %v65_v4, %v61_v5  ;;  %v68_v10 = vmul.f32 %v65_v4, %v62_v7  ;;  %vm272_vm3 = vmpackc.low %vm57_vm1, %vm56_vm0  ;;  %vm59_vm4 = vcmp.ge.f32.partialorder %v53_v11, %v55_v1  ;;  %p180_p0 = pnand %p179_p13, %p173_p10 }
  0x2b   :  { %v69_v14 = vmul.f32 %v65_v4, %v63_v12  ;;  %vm79_vm5 = vmpackc.low %vm59_vm4, %vm58_vm2 }
  0x2c   :  { %v70_v15 = vsel %vm56_vm0, %v66_v8, 0.0  ;;  %v71_v16 = vsel %vm57_vm1, %v67_v9, 0.0  ;;  %v72_v17 = vsel %vm58_vm2, %v68_v10, 0.0  ;;  %vm80_vm6 = vmpackc.even %vm79_vm5, %vm272_vm3 }
  0x2d   :  { %74 = vst [vmem:[#allocation9] sm:$0xff] %v70_v15  ;;  %75 = vst [vmem:[#allocation9 + $0x8] sm:$0xff] %v71_v16  ;;  %v73_v18 = vsel %vm59_vm4, %v69_v14, 0.0  ;;  %v81_v20 = vsel %vm80_vm6, 16843009, %v229_v19 }
  0x2e   :  { %76 = vst [vmem:[#allocation9 + $0x10] sm:$0xff] %v72_v17  ;;  %77 = vst [vmem:[#allocation9 + $0x18] sm:$0xff] %v73_v18 }
  0x2f   :  { %82 = vst [vmem:[#allocation10] sm:$0xff] %v81_v20 }
  0x30   :  { %183 = shalt.err (!%p180_p0)
}
  0x31   :  { %94 = dma.vmem_to_hbm [thread:$0]  %s89_s5, 512, %s292_s3, [#allocation6], %s224_s21, %s224_s21, %s225_s22  }
  0x32   :  { %s192_s10 = scalar_lea.vmem %s102_s6, 128  ;;  %p197_p2 = scmp.lt.s32.totalorder %s102_s6, %s102_s6 }
  0x33   :  { %p193_p1 = scmp.ne.s32.totalorder %s102_s6, %s192_s10  ;;  %p198_p3 = scmp.lt.s32.totalorder %s192_s10, %s192_s10 }
  0x35   :  { %p199_p4 = por %p198_p3, %p197_p2 }
  0x37   :  { %p200_p5 = pnand %p199_p4, %p193_p1 }
  0x39   :  { %203 = shalt.err (!%p200_p5)
}
  0x3a   :  { %104 = dma.vmem_to_hbm [thread:$0]  %s102_s6, 128, %s293_s4, [#allocation11]  }
  0x3b   :  { %218 = dma.done.wait [#allocation6], 512  }
  0x3c   :  { %219 = vsyncadd [#allocation6], 4294966784 }
  0x3d   :  { %220 = dma.done.wait [#allocation11], 128  }
  0x3e   :  { %221 = vsyncadd [#allocation11], 4294967168 }
  0x3f   :  { %111 = vsyncpa [#allocation5], 1 }
  0x40   :  { %112 = vsyncpa [#allocation8], 1 }
  0x41   :  { %113 = vsyncpa [#allocation6], 1 }
  0x42   :  { %114 = vsyncpa [#allocation11], 1 }

</bundles_post_ra>
